<compile_context>
chip_gen: v5e
topology: v5e:2x2
jax: 0.10.0
libtpu: 0.0.40
codegen_flags: <defaults>
</compile_context>

<pallas_src>
import functools

import jax
import jax.numpy as jnp
from jax import lax
from jax.experimental import pallas as pl
from jax.experimental.pallas import tpu as pltpu

_LANE = 128


def _tensorcores_per_device() -> int:
    """2 on chips whose 'parallel' grid axes split across TensorCores (v7x,
    megacore v4/v5p); 1 on v5e/v6e.  Correct either way -- only perf differs."""
    try:
        kind = jax.devices()[0].device_kind.lower()
    except Exception:
        return 1
    return 2 if any(tag in kind for tag in ("v7", "v4", "v5p")) else 1


def clustering_loss_kernel(recon_ref, orig_ref, probs_ref, emb_ref,
                           out_ref, acc_ref, *,
                           tiles_per_core, tile_rows, rows_total, needs_mask):
    """Streams the squared error over tiles; tiny terms run once per core.

    recon_ref, orig_ref : (tile_rows, 128) VMEM   -- one tile of flattened images
    probs_ref           : (B, K) VMEM             -- cluster probabilities (resident)
    emb_ref             : (B, D) VMEM             -- embeddings (resident)
    out_ref             : (1, 8, 128) VMEM        -- [0,0,0]=partial sq-sum,
                                                     [0,0,1]=distribution,
                                                     [0,0,2]=separation
    acc_ref             : (tile_rows, 128) f32 VMEM scratch accumulator
    """
    c = pl.program_id(0)   # TensorCore-split axis ("parallel")
    i = pl.program_id(1)   # streaming tile axis ("arbitrary")

    # ---- init the vector accumulator (once per core) -------------------------
    @pl.when(i == 0)
    def _():
        acc_ref[...] = jnp.zeros_like(acc_ref)

    # ---- per-tile squared error: pure VPU adds, no per-tile reduction --------
    d = recon_ref[...].astype(jnp.float32) - orig_ref[...].astype(jnp.float32)
    sq = d * d
    if needs_mask:
        # Ragged / out-of-bounds tail rows carry undefined data -> zero them.
        row0 = (c * tiles_per_core + i) * tile_rows
        rows = row0 + lax.broadcasted_iota(jnp.int32, sq.shape, 0)
        sq = jnp.where(rows < rows_total, sq, 0.0)
    acc_ref[...] += sq

    # ---- finalize: single cross-lane reduce + tiny cluster terms -------------
    @pl.when(i == tiles_per_core - 1)
    def _():
        sq_sum = jnp.sum(acc_ref[...])                       # once per core

        # cluster distribution entropy term
        probs = probs_ref[...].astype(jnp.float32)           # (B, K)
        cd = jnp.mean(probs, axis=0, keepdims=True)          # (1, K)
        dist_loss = -jnp.sum(cd * jnp.log(cd + 1e-9))

        # separation term: similarity = emb @ emb.T  (MXU)
        emb = emb_ref[...].astype(jnp.float32)               # (B, D)
        sim = lax.dot_general(emb, emb, (((1,), (1,)), ((), ())),
                              preferred_element_type=jnp.float32)   # (B, B)

        # argmax over clusters (first maximal index) -> one-hot -> same-cluster
        # mask via the Gram matrix of the one-hot assignments.
        K = probs.shape[1]
        col_ids = lax.broadcasted_iota(jnp.int32, probs.shape, 1)   # (B, K)
        max_val = jnp.max(probs, axis=1, keepdims=True)             # (B, 1)
        cand = jnp.where(probs == max_val, col_ids, jnp.int32(K))
        targets = jnp.min(cand, axis=1, keepdims=True)              # (B, 1)
        onehot = (col_ids == targets).astype(jnp.float32)           # (B, K)
        same = lax.dot_general(onehot, onehot, (((1,), (1,)), ((), ())),
                               preferred_element_type=jnp.float32)  # (B, B)
        sep_loss = jnp.mean(sim * (1.0 - same))

        # Pack the three scalars into lanes (0,1,2) of sublane 0 of a
        # lane-dense (1,8,128) output block -- no scalar SMEM stores.
        sub = lax.broadcasted_iota(jnp.int32, (1, 8, 128), 1)
        lanes = lax.broadcasted_iota(jnp.int32, (1, 8, 128), 2)
        res = jnp.where((sub == 0) & (lanes == 0), sq_sum, 0.0)
        res = jnp.where((sub == 0) & (lanes == 1), dist_loss, res)
        res = jnp.where((sub == 0) & (lanes == 2), sep_loss, res)
        out_ref[...] = res


def clustering_loss(reconstructed, original, cluster_probs, embedding,
                    *, target_tile_bytes=1 << 20):
    """Flatten images to a lane-dense slab, tile it, stream through the kernel."""
    assert reconstructed.shape == original.shape
    assert cluster_probs.ndim == 2 and embedding.ndim == 2

    n_elems = int(reconstructed.size)
    inv_n = 1.0 / float(n_elems)

    r = reconstructed.reshape(-1)
    o = original.reshape(-1)
    rem = n_elems % _LANE
    if rem:
        # TODO(synk): lane-ragged inputs take one small zero-pad copy to reach
        # a 128-lane boundary (zeros contribute 0 to the squared error).
        pad = _LANE - rem
        r = jnp.pad(r, (0, pad))
        o = jnp.pad(o, (0, pad))
    rows_total = r.shape[0] // _LANE
    r2 = r.reshape(rows_total, _LANE)
    o2 = o.reshape(rows_total, _LANE)

    # ---- tile sizing: ~target_tile_bytes per streamed input tile -------------
    itemsize = jnp.dtype(reconstructed.dtype).itemsize
    rows_cap = max(8, (int(target_tile_bytes) // (_LANE * itemsize)) // 8 * 8)
    if rows_total <= rows_cap:
        tile_rows = rows_total          # single tile, block == full extent
    else:
        tile_rows = rows_cap            # multiple of 8; tail tile masked
    num_tiles = pl.cdiv(rows_total, tile_rows)

    # ---- optional 2-TensorCore split of the streamed row axis ---------------
    num_split = max(1, min(_tensorcores_per_device(), num_tiles))
    tiles_per_core = pl.cdiv(num_tiles, num_split)
    needs_mask = (num_split * tiles_per_core * tile_rows) != rows_total
    exact = (num_split * tiles_per_core) == num_tiles

    if exact:
        def stream_map(c, i):
            return (c * tiles_per_core + i, 0)
    else:
        last_tile = num_tiles - 1

        def stream_map(c, i):
            # Clamp fully out-of-range tiles to a valid block (their
            # contribution is zeroed by the in-kernel row mask).
            return (jnp.minimum(c * tiles_per_core + i, last_tile), 0)

    kernel = functools.partial(
        clustering_loss_kernel,
        tiles_per_core=tiles_per_core,
        tile_rows=tile_rows,
        rows_total=rows_total,
        needs_mask=needs_mask,
    )

    out = pl.pallas_call(
        kernel,
        out_shape=jax.ShapeDtypeStruct((num_split, 8, 128), jnp.float32),
        grid_spec=pltpu.PrefetchScalarGridSpec(
            num_scalar_prefetch=0,
            grid=(num_split, tiles_per_core),
            in_specs=[
                pl.BlockSpec((tile_rows, _LANE), stream_map),   # reconstructed
                pl.BlockSpec((tile_rows, _LANE), stream_map),   # original
                pl.BlockSpec(cluster_probs.shape, lambda c, i: (0, 0)),  # resident
                pl.BlockSpec(embedding.shape, lambda c, i: (0, 0)),      # resident
            ],
            out_specs=pl.BlockSpec((1, 8, 128), lambda c, i: (c, 0, 0)),
            scratch_shapes=[pltpu.VMEM((tile_rows, _LANE), jnp.float32)],
        ),
        compiler_params=pltpu.CompilerParams(
            dimension_semantics=("parallel", "arbitrary")),
    )(r2, o2, cluster_probs, embedding)

    # Combine per-core partials; add the tiny terms (from core 0).
    recon_loss = jnp.sum(out[:, 0, 0]) * jnp.float32(inv_n)
    dist_loss = out[0, 0, 1]
    sep_loss = out[0, 0, 2]
    total_loss = recon_loss + 0.1 * dist_loss + 0.1 * sep_loss
    stats = {
        "reconstruction": recon_loss,
        "distribution": dist_loss,
        "separation": sep_loss,
    }
    return total_loss, stats


def _reference(reconstructed, original, cluster_probs, embedding):
    """Pure-JAX reference matching the PyTorch forward exactly."""
    recon_loss = jnp.mean((reconstructed - original) ** 2)
    cd = cluster_probs.mean(axis=0)
    dist_loss = -jnp.sum(cd * jnp.log(cd + 1e-9))
    sim = embedding @ embedding.T
    tgt = jnp.argmax(cluster_probs, axis=1)
    mask = (tgt[None, :] == tgt[:, None]).astype(jnp.float32)
    sep_loss = jnp.mean(sim * (1.0 - mask))
    total = recon_loss + 0.1 * dist_loss + 0.1 * sep_loss
    return total, recon_loss, dist_loss, sep_loss


def _check(reconstructed, original, cluster_probs, embedding, **kw):
    total, stats = clustering_loss(reconstructed, original, cluster_probs,
                                   embedding, **kw)
    total = jax.block_until_ready(total)
    ref_total, ref_recon, ref_dist, ref_sep = _reference(
        reconstructed, original, cluster_probs, embedding)
    assert jnp.allclose(total, ref_total, rtol=1e-5, atol=1e-5), (total, ref_total)
    assert jnp.allclose(stats["reconstruction"], ref_recon, rtol=1e-5, atol=1e-5)
    assert jnp.allclose(stats["distribution"], ref_dist, rtol=1e-5, atol=1e-5)
    assert jnp.allclose(stats["separation"], ref_sep, rtol=1e-5, atol=1e-5)


if __name__ == "__main__":
    # Small shapes consistent with the module's forward signature.
    B, C, H, W = 2, 4, 16, 16   # image batch (NCHW)
    K = 8                       # n_clusters
    D = 32                      # embedding dim

    key = jax.random.PRNGKey(0)
    k1, k2, k3, k4 = jax.random.split(key, 4)

    reconstructed = jax.random.normal(k1, (B, C, H, W), dtype=jnp.float32)
    original = jax.random.normal(k2, (B, C, H, W), dtype=jnp.float32)
    cluster_logits = jax.random.normal(k3, (B, K), dtype=jnp.float32)
    cluster_probs = jax.nn.softmax(cluster_logits, axis=-1)
    embedding = jax.random.normal(k4, (B, D), dtype=jnp.float32)

    # Main (small) case: single tile, no masking.
    _check(reconstructed, original, cluster_probs, embedding)

    # Second case exercises the multi-tile + ragged-tail-mask path with tiny
    # forced tiles (no full-slab padding in the wrapper).
    k5, k6 = jax.random.split(k4)
    rec2 = jax.random.normal(k5, (2, 4, 30, 30), dtype=jnp.float32)
    org2 = jax.random.normal(k6, (2, 4, 30, 30), dtype=jnp.float32)
    _check(rec2, org2, cluster_probs, embedding, target_tile_bytes=8 * 128 * 4)

    print("KERNEL_OK")
</pallas_src>

<mosaic_0001>
module attributes {stable_mosaic.version = 11 : i64} {
  func.func @clustering_loss_kernel(%arg0: i32, %arg1: i32, %arg2: memref<16x128xf32, #tpu.memory_space<vmem>>, %arg3: memref<16x128xf32, #tpu.memory_space<vmem>>, %arg4: memref<2x8xf32, #tpu.memory_space<vmem>>, %arg5: memref<2x32xf32, #tpu.memory_space<vmem>>, %arg6: memref<1x8x128xf32, #tpu.memory_space<vmem>>, %arg7: memref<16x128xf32, #tpu.memory_space<vmem>>) attributes {dimension_semantics = [#tpu.dimension_semantics<parallel>, #tpu.dimension_semantics<arbitrary>], iteration_bounds = array<i64: 1, 1>, scalar_prefetch = 0 : i64, scratch_operands = 1 : i64, tpu.core_type = #tpu.core_type<tc>, window_params = [{transform_indices = @transform_0, window_bounds = array<i64: 16, 128>}, {transform_indices = @transform_1, window_bounds = array<i64: 16, 128>}, {pipeline_mode = #tpu.pipeline_mode<synchronous>, transform_indices = @transform_2, window_bounds = array<i64: 2, 8>}, {pipeline_mode = #tpu.pipeline_mode<synchronous>, transform_indices = @transform_3, window_bounds = array<i64: 2, 32>}, {transform_indices = @transform_4, window_bounds = array<i64: 1, 8, 128>}]} {
    %c0_i32 = arith.constant 0 : i32
    %0 = arith.cmpi eq, %arg1, %c0_i32 : i32
    %1 = arith.extui %0 : i1 to i32
    %c0_i32_0 = arith.constant 0 : i32
    %2 = arith.cmpi ne, %1, %c0_i32_0 : i32
    scf.if %2 {
      %cst = arith.constant 0.000000e+00 : f32
      %13 = vector.broadcast %cst : f32 to vector<16x128xf32>
      %c0_10 = arith.constant 0 : index
      %c0_11 = arith.constant 0 : index
      %14 = vector.load %arg7[%c0_10, %c0_11] : memref<16x128xf32, #tpu.memory_space<vmem>>, vector<16x128xf32>
      tpu.vector_store %arg7[%c0_10, %c0_11], %13 {strides = array<i32>} : memref<16x128xf32, #tpu.memory_space<vmem>>, vector<16x128xf32>,
    } else {
    }
    %c0 = arith.constant 0 : index
    %c0_1 = arith.constant 0 : index
    %3 = vector.load %arg2[%c0, %c0_1] : memref<16x128xf32, #tpu.memory_space<vmem>>, vector<16x128xf32>
    %c0_2 = arith.constant 0 : index
    %c0_3 = arith.constant 0 : index
    %4 = vector.load %arg3[%c0_2, %c0_3] : memref<16x128xf32, #tpu.memory_space<vmem>>, vector<16x128xf32>
    %5 = arith.subf %3, %4 : vector<16x128xf32>
    %6 = arith.mulf %5, %5 : vector<16x128xf32>
    %c0_4 = arith.constant 0 : index
    %c0_5 = arith.constant 0 : index
    %7 = vector.load %arg7[%c0_4, %c0_5] : memref<16x128xf32, #tpu.memory_space<vmem>>, vector<16x128xf32>
    %8 = arith.addf %7, %6 : vector<16x128xf32>
    %c0_6 = arith.constant 0 : index
    %c0_7 = arith.constant 0 : index
    %9 = vector.load %arg7[%c0_6, %c0_7] : memref<16x128xf32, #tpu.memory_space<vmem>>, vector<16x128xf32>
    tpu.vector_store %arg7[%c0_6, %c0_7], %8 {strides = array<i32>} : memref<16x128xf32, #tpu.memory_space<vmem>>, vector<16x128xf32>,
    %c0_i32_8 = arith.constant 0 : i32
    %10 = arith.cmpi eq, %arg1, %c0_i32_8 : i32
    %11 = arith.extui %10 : i1 to i32
    %c0_i32_9 = arith.constant 0 : i32
    %12 = arith.cmpi ne, %11, %c0_i32_9 : i32
    scf.if %12 {
      %c0_10 = arith.constant 0 : index
      %c0_11 = arith.constant 0 : index
      %13 = vector.load %arg7[%c0_10, %c0_11] : memref<16x128xf32, #tpu.memory_space<vmem>>, vector<16x128xf32>
      %14 = vector.shape_cast %13 : vector<16x128xf32> to vector<1x16x128xf32>
      %cst = arith.constant dense<0.000000e+00> : vector<1xf32>
      %15 = vector.multi_reduction <add>, %14, %cst [1, 2] : vector<1x16x128xf32> to vector<1xf32>
      %16 = vector.shape_cast %15 : vector<1xf32> to vector<1x1x1xf32>
      %17 = vector.extract %16[0, 0, 0] : f32 from vector<1x1x1xf32>
      %c0_12 = arith.constant 0 : index
      %c0_13 = arith.constant 0 : index
      %18 = vector.load %arg4[%c0_12, %c0_13] : memref<2x8xf32, #tpu.memory_space<vmem>>, vector<2x8xf32>
      %cst_14 = arith.constant dense<0.000000e+00> : vector<8xf32>
      %19 = vector.multi_reduction <add>, %18, %cst_14 [0] : vector<2x8xf32> to vector<8xf32>
      %20 = vector.shape_cast %19 : vector<8xf32> to vector<1x8xf32>
      %cst_15 = arith.constant 2.000000e+00 : f32
      %21 = vector.broadcast %cst_15 : f32 to vector<1x8xf32>
      %22 = arith.divf %20, %21 : vector<1x8xf32>
      %cst_16 = arith.constant 9.99999971E-10 : f32
      %23 = vector.broadcast %cst_16 : f32 to vector<1x8xf32>
      %24 = arith.addf %22, %23 : vector<1x8xf32>
      %25 = math.log %24 : vector<1x8xf32>
      %26 = arith.mulf %22, %25 : vector<1x8xf32>
      %27 = vector.shape_cast %26 : vector<1x8xf32> to vector<1x1x8xf32>
      %cst_17 = arith.constant dense<0.000000e+00> : vector<1xf32>
      %28 = vector.multi_reduction <add>, %27, %cst_17 [1, 2] : vector<1x1x8xf32> to vector<1xf32>
      %29 = vector.shape_cast %28 : vector<1xf32> to vector<1x1x1xf32>
      %30 = vector.extract %29[0, 0, 0] : f32 from vector<1x1x1xf32>
      %cst_18 = arith.constant 0.000000e+00 : f32
      %31 = arith.subf %cst_18, %30 : f32
      %c0_19 = arith.constant 0 : index
      %c0_20 = arith.constant 0 : index
      %32 = vector.load %arg5[%c0_19, %c0_20] : memref<2x32xf32, #tpu.memory_space<vmem>>, vector<2x32xf32>
      %cst_21 = arith.constant dense<0.000000e+00> : vector<2x2xf32>
      %33 = tpu.matmul %32, %32, %cst_21 {dimension_numbers = #tpu.dot_dimension_numbers<[1], [1], [0], [0], [0, 0, 1, 0], [], []>} : vector<2x32xf32>, vector<2x32xf32>, vector<2x2xf32> -> vector<2x2xf32>
      %34 = tpu.iota {dimensions = array<i32: 1>} : vector<2x8xi32>
      %cst_22 = arith.constant dense<0xFF800000> : vector<2xf32>
      %35 = vector.multi_reduction <maximumf>, %18, %cst_22 [1] : vector<2x8xf32> to vector<2xf32>
      %36 = vector.shape_cast %35 : vector<2xf32> to vector<2x1xf32>
      %37 = vector.broadcast %36 : vector<2x1xf32> to vector<2x8xf32>
      %38 = arith.cmpf oeq, %18, %37 : vector<2x8xf32>
      %c8_i32 = arith.constant 8 : i32
      %39 = vector.broadcast %c8_i32 : i32 to vector<2x8xi32>
      %40 = arith.select %38, %34, %39 : vector<2x8xi1>, vector<2x8xi32>
      %cst_23 = arith.constant dense<2147483647> : vector<2xi32>
      %41 = vector.multi_reduction <minsi>, %40, %cst_23 [1] : vector<2x8xi32> to vector<2xi32>
      %42 = vector.shape_cast %41 : vector<2xi32> to vector<2x1xi32>
      %43 = vector.broadcast %42 : vector<2x1xi32> to vector<2x8xi32>
      %44 = arith.cmpi eq, %34, %43 : vector<2x8xi32>
      %45 = arith.extui %44 : vector<2x8xi1> to vector<2x8xi32>
      %46 = arith.sitofp %45 : vector<2x8xi32> to vector<2x8xf32>
      %cst_24 = arith.constant dense<0.000000e+00> : vector<2x2xf32>
      %47 = tpu.matmul %46, %46, %cst_24 {dimension_numbers = #tpu.dot_dimension_numbers<[1], [1], [0], [0], [0, 0, 1, 0], [], []>} : vector<2x8xf32>, vector<2x8xf32>, vector<2x2xf32> -> vector<2x2xf32>
      %cst_25 = arith.constant 1.000000e+00 : f32
      %48 = vector.broadcast %cst_25 : f32 to vector<2x2xf32>
      %49 = arith.subf %48, %47 : vector<2x2xf32>
      %50 = arith.mulf %33, %49 : vector<2x2xf32>
      %51 = vector.shape_cast %50 : vector<2x2xf32> to vector<1x2x2xf32>
      %cst_26 = arith.constant dense<0.000000e+00> : vector<1xf32>
      %52 = vector.multi_reduction <add>, %51, %cst_26 [1, 2] : vector<1x2x2xf32> to vector<1xf32>
      %53 = vector.shape_cast %52 : vector<1xf32> to vector<1x1x1xf32>
      %54 = vector.extract %53[0, 0, 0] : f32 from vector<1x1x1xf32>
      %cst_27 = arith.constant 4.000000e+00 : f32
      %55 = arith.divf %54, %cst_27 : f32
      %56 = tpu.iota {dimensions = array<i32: 1>} : vector<1x8x128xi32>
      %57 = tpu.iota {dimensions = array<i32: 2>} : vector<1x8x128xi32>
      %c0_i32_28 = arith.constant 0 : i32
      %58 = vector.broadcast %c0_i32_28 : i32 to vector<1x8x128xi32>
      %59 = arith.cmpi eq, %56, %58 : vector<1x8x128xi32>
      %c0_i32_29 = arith.constant 0 : i32
      %60 = vector.broadcast %c0_i32_29 : i32 to vector<1x8x128xi32>
      %61 = arith.cmpi eq, %57, %60 : vector<1x8x128xi32>
      %62 = arith.andi %59, %61 : vector<1x8x128xi1>
      %cst_30 = arith.constant 0.000000e+00 : f32
      %63 = vector.broadcast %17 : f32 to vector<1x8x128xf32>
      %64 = vector.broadcast %cst_30 : f32 to vector<1x8x128xf32>
      %65 = arith.select %62, %63, %64 : vector<1x8x128xi1>, vector<1x8x128xf32>
      %c0_i32_31 = arith.constant 0 : i32
      %66 = vector.broadcast %c0_i32_31 : i32 to vector<1x8x128xi32>
      %67 = arith.cmpi eq, %56, %66 : vector<1x8x128xi32>
      %c1_i32 = arith.constant 1 : i32
      %68 = vector.broadcast %c1_i32 : i32 to vector<1x8x128xi32>
      %69 = arith.cmpi eq, %57, %68 : vector<1x8x128xi32>
      %70 = arith.andi %67, %69 : vector<1x8x128xi1>
      %71 = vector.broadcast %31 : f32 to vector<1x8x128xf32>
      %72 = arith.select %70, %71, %65 : vector<1x8x128xi1>, vector<1x8x128xf32>
      %c0_i32_32 = arith.constant 0 : i32
      %73 = vector.broadcast %c0_i32_32 : i32 to vector<1x8x128xi32>
      %74 = arith.cmpi eq, %56, %73 : vector<1x8x128xi32>
      %c2_i32 = arith.constant 2 : i32
      %75 = vector.broadcast %c2_i32 : i32 to vector<1x8x128xi32>
      %76 = arith.cmpi eq, %57, %75 : vector<1x8x128xi32>
      %77 = arith.andi %74, %76 : vector<1x8x128xi1>
      %78 = vector.broadcast %55 : f32 to vector<1x8x128xf32>
      %79 = arith.select %77, %78, %72 : vector<1x8x128xi1>, vector<1x8x128xf32>
      %c0_33 = arith.constant 0 : index
      %c0_34 = arith.constant 0 : index
      %c0_35 = arith.constant 0 : index
      %80 = vector.load %arg6[%c0_33, %c0_34, %c0_35] : memref<1x8x128xf32, #tpu.memory_space<vmem>>, vector<1x8x128xf32>
      tpu.vector_store %arg6[%c0_33, %c0_34, %c0_35], %79 {strides = array<i32>} : memref<1x8x128xf32, #tpu.memory_space<vmem>>, vector<1x8x128xf32>,
    } else {
    }
    return
  }
  func.func @transform_0(%arg0: i32, %arg1: i32) -> (i32, i32) {
    %c1_i32 = arith.constant 1 : i32
    %0 = arith.muli %arg0, %c1_i32 : i32
    %1 = arith.addi %0, %arg1 : i32
    %c0_i32 = arith.constant 0 : i32
    %c0_i32_0 = arith.constant 0 : i32
    return %1, %c0_i32 : i32, i32
  }
  func.func @transform_1(%arg0: i32, %arg1: i32) -> (i32, i32) {
    %c1_i32 = arith.constant 1 : i32
    %0 = arith.muli %arg0, %c1_i32 : i32
    %1 = arith.addi %0, %arg1 : i32
    %c0_i32 = arith.constant 0 : i32
    %c0_i32_0 = arith.constant 0 : i32
    return %1, %c0_i32 : i32, i32
  }
  func.func @transform_2(%arg0: i32, %arg1: i32) -> (i32, i32) {
    %c0_i32 = arith.constant 0 : i32
    %c0_i32_0 = arith.constant 0 : i32
    %c0_i32_1 = arith.constant 0 : i32
    return %c0_i32, %c0_i32_0 : i32, i32
  }
  func.func @transform_3(%arg0: i32, %arg1: i32) -> (i32, i32) {
    %c0_i32 = arith.constant 0 : i32
    %c0_i32_0 = arith.constant 0 : i32
    %c0_i32_1 = arith.constant 0 : i32
    return %c0_i32, %c0_i32_0 : i32, i32
  }
  func.func @transform_4(%arg0: i32, %arg1: i32) -> (i32, i32, i32) {
    %c0_i32 = arith.constant 0 : i32
    %c0_i32_0 = arith.constant 0 : i32
    %c0_i32_1 = arith.constant 0 : i32
    return %arg0, %c0_i32, %c0_i32_0 : i32, i32, i32
  }
}

</mosaic_0001>

<bundles_post_ra>
// kernel: tpu_custom_call.1
= control target key start
LH: loop header
LB: loop body
LE: loop exit
PB: predicated region body
PF: predicated region fallthrough
CT: control target
= control target key end

     0   :  { %9 = vsyncpa [#allocation4], 0  ;;  %s467_s0 = inlined_call_operand.hbm [shape: f32[16,128], index: 0, kind: input, shape index: {}]   ;;  %s468_s1 = inlined_call_operand.hbm [shape: f32[16,128], index: 1, kind: input, shape index: {}]   ;;  %s469_s2 = inlined_call_operand.hbm [shape: f32[2,8], index: 2, kind: input, shape index: {}]   ;;  %s470_s3 = inlined_call_operand.vmem [shape: f32[2,32], index: 3, kind: input, shape index: {}]   ;;  %s471_s4 = inlined_call_operand.hbm [shape: f32[1,8,128], index: 4, kind: output, shape index: {}]  }
   0x1   :  { %10 = vsyncpa [#allocation7], 0 }
   0x2   :  { %11 = vsyncpa [#allocation5], 0  ;;  %s37_s17 = sshll.u32 %s468_s1, 4  ;;  %s403_s18 = smov [#allocation6]   ;;  %s38_s17 = int_to_ptr.hbm [resolvable:$true] %s37_s17 }
   0x3   :  { %s39_s19 = sshll.u32 %s403_s18, 4  ;;  %s20_s22 = sshll.u32 %s467_s0, 4  ;;  %s40_s19 = int_to_ptr.vmem [resolvable:$true] %s39_s19  ;;  %s21_s22 = int_to_ptr.hbm [resolvable:$true] %s20_s22 }
   0x4   :  { %s404_s23 = smov 128   ;;  %s405_s24 = smov 8  }
   0x5   :  { %45 = dma.hbm_to_vmem [thread:$0]  %s38_s17, 256, %s40_s19, [#allocation7], %s404_s23, %s404_s23, %s405_s24  }
   0x6   :  { %s406_s25 = smov [#allocation3]   ;;  %s51_s29 = sshll.u32 %s469_s2, 4  ;;  %s52_s29 = int_to_ptr.hbm [resolvable:$true] %s51_s29 }
   0x7   :  { %s22_s26 = sshll.u32 %s406_s25, 4  ;;  %s407_s1 = smov [#allocation8]   ;;  %s23_s26 = int_to_ptr.vmem [resolvable:$true] %s22_s26 }
   0x8   :  { %28 = dma.hbm_to_vmem [thread:$0]  %s21_s22, 256, %s23_s26, [#allocation4], %s404_s23, %s404_s23, %s405_s24  }
   0x9   :  { %s53_s30 = sshll.u32 %s407_s1, 4  ;;  %s54_s30 = int_to_ptr.vmem [resolvable:$true] %s53_s30 }
   0xa   :  { %56 = dma.hbm_to_vmem [thread:$0]  %s52_s29, 32, %s54_s30, [#allocation7]  }
   0xb   :  { %397 = dma.done.wait [#allocation4], 256  }
   0xc   :  { %398 = vsyncadd [#allocation4], 4294967040 }
   0xd   :  { %399 = dma.done.wait [#allocation7], 288  }
   0xe   :  { %400 = vsyncadd [#allocation7], 4294967008  ;;  %vm111_vm0 = vcmask 58368   ;;  %v110_v0 = vld [vmem:[#allocation8] sm:$0x3]  ;;  %v168_v2 = vlaneseq  ;;  %vm144_vm3 = vcmask 261120  }
   0xf   :  { %v170_v1 = vsel %vm111_vm0, %v110_v0, -inf  ;;  %v112_v13 = vsel %vm111_vm0, %v110_v0, 0.0  ;;  %v143_v16 = vld [vmem:[%s470_s3] sm:$0x3]  ;;  %v408_v18 = vmov 2.0   ;;  %v82_v20 = vld [vmem:[#allocation3 + $0x8] sm:$0xff] }
  0x10   :  { %171 = vmax.xlane.f32.xlu0 %v170_v1  ;;  %v448_v3 = vand.u32 127, %v168_v2  ;;  %v113_v14 = vrot.slane %v112_v13, 4  ;;  %273 = vmatpush.xpose.msk.msra.mxu0 %vm144_vm3, %v143_v16  ;;  %295 = vrcp.f32 %v408_v18  ;;  %v81_v19 = vld [vmem:[#allocation3] sm:$0xff]  ;;  %v83_v21 = vld [vmem:[#allocation6] sm:$0xff]  ;;  %v84_v22 = vld [vmem:[#allocation6 + $0x8] sm:$0xff]  ;;  %vm193_vm5 = vcmask 64512  }
  0x11   :  { %v85_v23 = vsub.f32 %v81_v19, %v83_v21  ;;  %v86_v24 = vsub.f32 %v82_v20, %v84_v22  ;;  %v409_v45 = vmov 0.0   ;;  %vm131_vm7 = vcmask 57344   ;;  %s411_s8 = smov [#allocation9]   ;;  %s262_s13 = sshll.u32 %s471_s4, 4  ;;  %s263_s13 = int_to_ptr.hbm [resolvable:$true] %s262_s13 }
  0x12   :  { %v114_v15 = vadd.f32 %v113_v14, %v112_v13  ;;  %vm219_vm8 = vcmask 9216   ;;  %v240_v21 = vshrl.u32 %v168_v2, 7  ;;  %vm242_vm11 = vcmp.eq.s32.totalorder %v448_v3, 0  ;;  %s260_s9 = sshll.u32 %s411_s8, 4  ;;  %s261_s9 = int_to_ptr.vmem [resolvable:$true] %s260_s9 }
  0x13   :  { %274 = vmatmul.msk.f32.vlgmr.msra.gmra.mxu0 %vm144_vm3, %v143_v16  ;;  %v87_v25 = vmul.f32 %v85_v23, %v85_v23  ;;  %v88_v27 = vmul.f32 %v86_v24, %v86_v24  ;;  %vm246_vm13 = vcmp.eq.s32.totalorder %v448_v3, 1  ;;  %vm250_vm14 = vcmp.eq.s32.totalorder %v448_v3, 2 }
  0x14   :  { %v115_v17 = vrot.slane %v114_v15, 2  ;;  %vm241_vm10 = vcmp.eq.s32.totalorder %v240_v21, 0 }
  0x15   :  { %v100_v29 = vadd.f32 %v88_v27, %v87_v25  ;;  %vm243_vm12 = vmand %vm241_vm10, %vm242_vm11 }
  0x16   :  { %v116_v26 = vadd.f32 %v115_v17, %v114_v15  ;;  %v296_v28 = vpop.eup %295  ;;  %vm247_vm15 = vmand %vm241_vm10, %vm246_vm13 }
  0x17   :  { %v120_v30 = vmul.f32 2.0, %v296_v28  ;;  %vm124_vm4 = vweird.f32 %v296_v28 }
  0x18   :  { %v117_v31 = vrot.slane %v116_v26, 1 }
  0x19   :  { %v121_v32 = vsub.f32 1.0, %v120_v30 }
  0x1a   :  { %v118_v34 = vadd.f32 %v117_v31, %v116_v26 }
  0x1b   :  { %v122_v33 = vmul.f32 %v296_v28, %v121_v32 }
  0x1d   :  { %v123_v35 = vadd.f32 %v296_v28, %v122_v33 }
  0x1f   :  { %v125_v36 = vsel %vm124_vm4, %v296_v28, %v123_v35 }
  0x20   :  { %v126_v37 = vmul.f32 %v125_v36, %v118_v34 }
  0x22   :  { %v127_v39 = vadd.f32 1e-09, %v126_v37 }
  0x24   :  { %297 = vlog2.f32 %v127_v39 }
  0x2a   :  { %v298_v44 = vpop.eup %297 }
  0x2b   :  { %v129_v47 = vmul.f32 0.6931472, %v298_v44 }
  0x2d   :  { %v130_v48 = vmul.f32 %v129_v47, %v126_v37 }
  0x2f   :  { %v132_v49 = vsel %vm131_vm7, %v130_v48, 0.0 }
  0x30   :  { %133 = vadd.xlane.f32.xlu2 %v132_v49 }
  0x83   :  { %v172_v4 = vpop.xlane.xlu0 %171 }
  0x84   :  { %vm173_vm1 = vcmp.eq.f32.partialorder %v110_v0, %v172_v4 }
  0x85   :  { %v174_v5 = vsel %vm173_vm1, %v448_v3, 8 }
  0x86   :  { %v175_v6 = vsel %vm111_vm0, %v174_v5, 2147483647  ;;  %vm251_vm0 = vmand %vm241_vm10, %vm250_vm14 }
  0x87   :  { %v177_v7 = vshra.s32 %v175_v6, 16  ;;  %v176_v9 = vand.u32 65535, %v175_v6 }
  0x89   :  { %v179_v8 = vcvt.s32.f32 %v177_v7  ;;  %v178_v11 = vcvt.s32.f32 %v176_v9  ;;  %v410_v7 = vmov 4.0  }
  0x8a   :  { %299 = vrcp.f32 %v410_v7 }
  0x8b   :  { %180 = vmin.xlane.f32.xlu0 %v179_v8 }
  0x90   :  { %v165_v63 = vpop.f32.mrf.mxu0 }
  0xa3   :  { %v134_v57 = vpop.xlane.xlu2 %133 }
  0xa4   :  { %v135_v58 = vrot.slane %v134_v57, 4 }
  0xa6   :  { %v136_v59 = vadd.f32 %v135_v58, %v134_v57 }
  0xa8   :  { %v137_v60 = vrot.slane %v136_v59, 2 }
  0xaa   :  { %v138_v61 = vadd.f32 %v137_v60, %v136_v59 }
  0xac   :  { %v139_v0 = vrot.slane %v138_v61, 1 }
  0xae   :  { %v140_v4 = vadd.f32 %v139_v0, %v138_v61 }
  0xfe   :  { %v181_v10 = vpop.xlane.xlu0 %180 }
  0xff   :  { %vm182_vm2 = vcmp.eq.f32.partialorder %v179_v8, %v181_v10  ;;  %v187_v38 = vcvt.f32.s32 %v181_v10  ;;  %v300_v8 = vpop.eup %299 }
 0x100   :  { %v183_v12 = vsel %vm182_vm2, %v178_v11, inf  ;;  %v231_v9 = vmul.f32 4.0, %v300_v8  ;;  %vm235_vm9 = vweird.f32 %v300_v8 }
 0x101   :  { %184 = vmin.xlane.f32.xlu1 %v183_v12  ;;  %v188_v41 = vshll.u32 %v187_v38, 16 }
 0x102   :  { %v232_v10 = vsub.f32 1.0, %v231_v9 }
 0x104   :  { %v233_v14 = vmul.f32 %v300_v8, %v232_v10 }
 0x106   :  { %v234_v17 = vadd.f32 %v300_v8, %v233_v14 }
 0x108   :  { %v236_v20 = vsel %vm235_vm9, %v300_v8, %v234_v17 }
 0x109   :  { %101 = vadd.xlane.f32.xlu1 %v100_v29 }
 0x174   :  { %v185_v40 = vpop.xlane.xlu1 %184 }
 0x175   :  { %v186_v42 = vcvt.f32.s32 %v185_v40 }
 0x177   :  { %v189_v43 = vadd.s32 %v188_v41, %v186_v42 }
 0x179   :  { %vm190_vm6 = vcmp.eq.s32.totalorder %v448_v3, %v189_v43 }
 0x17a   :  { %v275_v46 = vsel %vm190_vm6, 1.0, %v409_v45 }
 0x17b   :  { %276 = vmatpush.xpose.msk.msra.mxu1 %vm193_vm5, %v275_v46 }
 0x17c   :  { %v102_v50 = vpop.xlane.xlu1 %101 }
 0x17d   :  { %v103_v51 = vrot.slane %v102_v50, 4 }
 0x17e   :  { %277 = vmatmul.msk.f32.vlgmr.msra.gmra.mxu1 %vm193_vm5, %v275_v46 }
 0x17f   :  { %v104_v52 = vadd.f32 %v103_v51, %v102_v50 }
 0x181   :  { %v105_v53 = vrot.slane %v104_v52, 2 }
 0x183   :  { %v106_v54 = vadd.f32 %v105_v53, %v104_v52 }
 0x185   :  { %v107_v55 = vrot.slane %v106_v54, 1 }
 0x187   :  { %v108_v56 = vadd.f32 %v107_v55, %v106_v54 }
 0x189   :  { %278 = vpush %v108_v56 }
 0x18a   :  { %280 = vpush %v140_v4 }
 0x1ba   :  { %s279_s3 = spop %278 }
 0x1bb   :  { %s281_s5 = spop %280  ;;  %v244_v22 = vstv %s279_s3 }
 0x1bc   :  { %s142_s6 = ssub.f32 0.0, %s281_s5  ;;  %v245_v23 = vsel %vm243_vm12, %v244_v22, 0.0 }
 0x1be   :  { %v248_v2 = vstv %s142_s6 }
 0x1bf   :  { %v249_v24 = vsel %vm247_vm15, %v248_v2, %v245_v23 }
 0x1fb   :  { %v214_v62 = vpop.f32.mrf.mxu1 }
 0x1fc   :  { %v217_v1 = vsub.f32 1.0, %v214_v62 }
 0x1fe   :  { %v218_v5 = vmul.f32 %v217_v1, %v165_v63 }
 0x200   :  { %v220_v6 = vsel %vm219_vm8, %v218_v5, 0.0 }
 0x201   :  { %221 = vadd.xlane.f32.xlu2 %v220_v6 }
 0x274   :  { %v222_v11 = vpop.xlane.xlu2 %221 }
 0x275   :  { %v223_v12 = vrot.slane %v222_v11, 4 }
 0x277   :  { %v224_v13 = vadd.f32 %v223_v12, %v222_v11 }
 0x279   :  { %v225_v15 = vrot.slane %v224_v13, 2 }
 0x27b   :  { %v226_v16 = vadd.f32 %v225_v15, %v224_v13 }
 0x27d   :  { %v227_v18 = vrot.slane %v226_v16, 1 }
 0x27f   :  { %v228_v19 = vadd.f32 %v227_v18, %v226_v16 }
 0x281   :  { %282 = vpush %v228_v19 }
 0x282   :  { %284 = vpush %v236_v20 }
 0x2b2   :  { %s283_s7 = spop %282 }
 0x2b3   :  { %s285_s10 = spop %284 }
 0x2b4   :  { %s238_s14 = smul.f32 %s285_s10, %s283_s7 }
 0x2b6   :  { %v252_v25 = vstv %s238_s14 }
 0x2b7   :  { %v253_v3 = vsel %vm251_vm0, %v252_v25, %v249_v24 }
 0x2b8   :  { %254 = vst [vmem:[#allocation9] sm:$0xff] %v253_v3 }
 0x2b9   :  { %265 = dma.vmem_to_hbm [thread:$0]  %s261_s9, 128, %s263_s13, [#allocation5]  }
 0x2ba   :  { %401 = dma.done.wait [#allocation5], 128  }
 0x2bb   :  { %402 = vsyncadd [#allocation5], 4294967168 }
 0x2bc   :  { %270 = vsyncpa [#allocation4], 1 }
 0x2bd   :  { %271 = vsyncpa [#allocation7], 1 }
 0x2be   :  { %272 = vsyncpa [#allocation5], 1 }

</bundles_post_ra>
